<compile_context>
chip_gen: v6e
topology: v6e:2x2x1
jax: 0.10.0
libtpu: 0.0.40
codegen_flags: <defaults>
</compile_context>

<pallas_src>
import functools

import jax
import jax.numpy as jnp
from jax.experimental import pallas as pl
from jax.experimental.pallas import tpu as pltpu

HIDDEN = 128
LANE = 128
PACK = 16                # bf16 sublane pack (also a multiple of the f32 pack of 8)
_CORE_SPLIT_ROWS = 256   # B >= this -> at least 2 grid steps (v7x dual TensorCore)
_NARROW_OUT_ROWS = 1024  # B >= this -> narrow (n_actions-wide) output writeback


def _round_up(n, m):
    return ((n + m - 1) // m) * m


def _cdiv(a, b):
    return (a + b - 1) // b


def dqn_kernel(x_ref, w1_ref, b1_ref, w2_ref, b2_ref, w3_ref, b3_ref, o_ref):
    """One batch tile of the 3-layer MLP.

    Matmul operands arrive in the compute dtype (f32 or bf16); accumulation is
    always f32 (preferred_element_type) and the bias-add / ReLU VPU work stays
    in f32.  The final store is either the full lane-dense 128-wide tile or a
    narrow n_actions-wide slice, depending on o_ref's shape.
    """
    x = x_ref[...]                                                     # (Bt, Kp)
    h1 = jnp.dot(x, w1_ref[...], preferred_element_type=jnp.float32)  # MXU
    h1 = jnp.maximum(h1 + b1_ref[...], 0.0)                           # (Bt, 128) f32

    h2 = jnp.dot(h1.astype(w2_ref.dtype), w2_ref[...],
                 preferred_element_type=jnp.float32)
    h2 = jnp.maximum(h2 + b2_ref[...], 0.0)                           # (Bt, 128) f32

    out = jnp.dot(h2.astype(w3_ref.dtype), w3_ref[...],
                  preferred_element_type=jnp.float32)                 # (Bt, 128)
    out = out + b3_ref[...]
    n_out = o_ref.shape[-1]                                           # 128 or n_actions
    o_ref[...] = out[:, :n_out].astype(o_ref.dtype)


@functools.partial(jax.jit, static_argnums=(2,),
                   static_argnames=("compute_dtype", "batch_tile",
                                    "lane_dense_out"))
def dqn_forward(x, params, n_actions, *, compute_dtype=jnp.float32,
                batch_tile=1024, lane_dense_out=None):
    """Forward pass. x: (B, n_observations) f32. Returns (B, n_actions) f32.

    compute_dtype=jnp.bfloat16 is an opt-in MXU fast path (f32 accumulation);
    the default f32 path matches the PyTorch module exactly.
    """
    w1, b1, w2, b2, w3, b3 = params
    B, n_obs = x.shape
    K_pad = w1.shape[0]          # n_obs rounded up to a multiple of 16
    N_pad = w3.shape[1]          # n_actions rounded up to 128 (lane-dense)

    # --- Balanced, pack-aligned batch tiling -------------------------------
    tiles = max(1, _cdiv(B, batch_tile))
    if B >= _CORE_SPLIT_ROWS:
        tiles = max(tiles, 2)                 # let v7x's two TCs both get work
    Bt = _round_up(_cdiv(B, tiles), PACK)     # balanced tile, 16-row aligned
    B_pad = Bt * tiles

    # --- Output layout: lane-dense (small B) vs narrow (large B) -----------
    if lane_dense_out is None:
        lane_dense_out = B < _NARROW_OUT_ROWS
    N_out = N_pad if lane_dense_out else n_actions

    x_pad = jnp.pad(x.astype(compute_dtype),
                    ((0, B_pad - B), (0, K_pad - n_obs)))

    def const(shape):            # weights/biases: same block every grid step
        return pl.BlockSpec(shape, lambda i: (0,) * len(shape))

    out_pad = pl.pallas_call(
        dqn_kernel,
        out_shape=jax.ShapeDtypeStruct((B_pad, N_out), jnp.float32),
        grid=(tiles,),
        in_specs=[
            pl.BlockSpec((Bt, K_pad), lambda i: (i, 0)),   # x tile
            const(w1.shape), const(b1.shape),
            const(w2.shape), const(b2.shape),
            const(w3.shape), const(b3.shape),
        ],
        out_specs=pl.BlockSpec((Bt, N_out), lambda i: (i, 0)),
        compiler_params=pltpu.CompilerParams(
            dimension_semantics=("parallel",)),
    )(x_pad,
      w1.astype(compute_dtype), b1,          # biases stay f32 (VPU work in f32)
      w2.astype(compute_dtype), b2,
      w3.astype(compute_dtype), b3)

    return out_pad[:B, :n_actions]


def init_params(key, n_observations, n_actions, hidden=HIDDEN):
    """PyTorch-default-like init, stored (in, out) and zero-padded to
    TPU-friendly shapes:
        w1: (round_up(n_obs, 16), 128)        b1: (1, 128)
        w2: (128, 128)                         b2: (1, 128)
        w3: (128, round_up(n_actions, 128))    b3: (1, round_up(n_actions, 128))
    Zero padding is numerically inert; the wrapper slices outputs back."""
    ks = jax.random.split(key, 6)

    def lin(kw, kb, fan_in, fan_out, pad_in, pad_out):
        bound = 1.0 / jnp.sqrt(jnp.float32(fan_in))
        w = jax.random.uniform(kw, (fan_in, fan_out), jnp.float32, -bound, bound)
        b = jax.random.uniform(kb, (1, fan_out), jnp.float32, -bound, bound)
        w = jnp.pad(w, ((0, pad_in - fan_in), (0, pad_out - fan_out)))
        b = jnp.pad(b, ((0, 0), (0, pad_out - fan_out)))
        return w, b

    k_in = _round_up(n_observations, PACK)
    n_out = _round_up(n_actions, LANE)
    w1, b1 = lin(ks[0], ks[1], n_observations, hidden, k_in, hidden)
    w2, b2 = lin(ks[2], ks[3], hidden, hidden, hidden, hidden)
    w3, b3 = lin(ks[4], ks[5], hidden, n_actions, hidden, n_out)
    return (w1, b1, w2, b2, w3, b3)


def reference_forward(x, params, n_actions, compute_dtype=jnp.float32):
    """Pure-JAX reference with the same padding / operand-cast scheme."""
    w1, b1, w2, b2, w3, b3 = params
    n_obs = x.shape[1]
    xp = jnp.pad(x, ((0, 0), (0, w1.shape[0] - n_obs)))
    cd = compute_dtype
    h1 = jnp.maximum(jnp.dot(xp.astype(cd), w1.astype(cd),
                             preferred_element_type=jnp.float32) + b1, 0.0)
    h2 = jnp.maximum(jnp.dot(h1.astype(cd), w2.astype(cd),
                             preferred_element_type=jnp.float32) + b2, 0.0)
    out = jnp.dot(h2.astype(cd), w3.astype(cd),
                  preferred_element_type=jnp.float32) + b3
    return out[:, :n_actions]


if __name__ == "__main__":
    key = jax.random.PRNGKey(0)
    k_x, k_p, k_x2 = jax.random.split(key, 3)

    batch = 32
    n_observations = 4   # e.g. CartPole observation dim
    n_actions = 2        # e.g. CartPole action dim

    x = jax.random.normal(k_x, (batch, n_observations), jnp.float32)
    params = init_params(k_p, n_observations, n_actions)

    # 1) Default exact-f32 path (matches the PyTorch module semantics tightly).
    out_f32 = jax.block_until_ready(dqn_forward(x, params, n_actions))
    ref_f32 = reference_forward(x, params, n_actions, jnp.float32)
    assert out_f32.shape == (batch, n_actions)
    assert jnp.allclose(out_f32, ref_f32, atol=1e-5, rtol=1e-5)

    # 2) Opt-in bf16-operand path (MXU fast path, f32 accumulation): tight check
    #    vs. a reference applying the same operand casts, plus a loose check vs.
    #    the f32 module semantics.
    out_bf16 = jax.block_until_ready(
        dqn_forward(x, params, n_actions, compute_dtype=jnp.bfloat16))
    ref_bf16 = reference_forward(x, params, n_actions, jnp.bfloat16)
    assert out_bf16.shape == (batch, n_actions)
    assert jnp.allclose(out_bf16, ref_bf16, atol=1e-4, rtol=1e-3)
    assert jnp.allclose(out_bf16, ref_f32, atol=5e-2, rtol=5e-2)

    # 3) Larger batch: exercises balanced multi-tile grid (>=2 tiles for v7x's
    #    two TensorCores) and the narrow (n_actions-wide) output writeback path.
    batch2 = 300
    x2 = jax.random.normal(k_x2, (batch2, n_observations), jnp.float32)
    out2 = jax.block_until_ready(
        dqn_forward(x2, params, n_actions, lane_dense_out=False))
    ref2 = reference_forward(x2, params, n_actions, jnp.float32)
    assert out2.shape == (batch2, n_actions)
    assert jnp.allclose(out2, ref2, atol=1e-5, rtol=1e-5)

    print("KERNEL_OK")
</pallas_src>

<mosaic_0001>
module attributes {stable_mosaic.version = 11 : i64} {
  func.func @dqn_kernel(%arg0: i32, %arg1: memref<32x16xf32, #tpu.memory_space<vmem>>, %arg2: memref<16x128xf32, #tpu.memory_space<vmem>>, %arg3: memref<1x128xf32, #tpu.memory_space<vmem>>, %arg4: memref<128x128xf32, #tpu.memory_space<vmem>>, %arg5: memref<1x128xf32, #tpu.memory_space<vmem>>, %arg6: memref<128x128xf32, #tpu.memory_space<vmem>>, %arg7: memref<1x128xf32, #tpu.memory_space<vmem>>, %arg8: memref<32x128xf32, #tpu.memory_space<vmem>>) attributes {dimension_semantics = [#tpu.dimension_semantics<parallel>], iteration_bounds = array<i64: 1>, scalar_prefetch = 0 : i64, scratch_operands = 0 : i64, tpu.core_type = #tpu.core_type<tc>, window_params = [{transform_indices = @transform_0, window_bounds = array<i64: 32, 16>}, {pipeline_mode = #tpu.pipeline_mode<synchronous>, transform_indices = @transform_1, window_bounds = array<i64: 16, 128>}, {pipeline_mode = #tpu.pipeline_mode<synchronous>, transform_indices = @transform_2, window_bounds = array<i64: 1, 128>}, {pipeline_mode = #tpu.pipeline_mode<synchronous>, transform_indices = @transform_3, window_bounds = array<i64: 128, 128>}, {pipeline_mode = #tpu.pipeline_mode<synchronous>, transform_indices = @transform_4, window_bounds = array<i64: 1, 128>}, {pipeline_mode = #tpu.pipeline_mode<synchronous>, transform_indices = @transform_5, window_bounds = array<i64: 128, 128>}, {pipeline_mode = #tpu.pipeline_mode<synchronous>, transform_indices = @transform_6, window_bounds = array<i64: 1, 128>}, {transform_indices = @transform_7, window_bounds = array<i64: 32, 128>}]} {
    %c0 = arith.constant 0 : index
    %c0_0 = arith.constant 0 : index
    %0 = vector.load %arg1[%c0, %c0_0] : memref<32x16xf32, #tpu.memory_space<vmem>>, vector<32x16xf32>
    %c0_1 = arith.constant 0 : index
    %c0_2 = arith.constant 0 : index
    %1 = vector.load %arg2[%c0_1, %c0_2] : memref<16x128xf32, #tpu.memory_space<vmem>>, vector<16x128xf32>
    %cst = arith.constant dense<0.000000e+00> : vector<32x128xf32>
    %2 = tpu.matmul %0, %1, %cst {dimension_numbers = #tpu.dot_dimension_numbers<[1], [0], [0], [1], [0, 0, 1, 1], [], []>} : vector<32x16xf32>, vector<16x128xf32>, vector<32x128xf32> -> vector<32x128xf32>
    %c0_3 = arith.constant 0 : index
    %c0_4 = arith.constant 0 : index
    %3 = vector.load %arg3[%c0_3, %c0_4] : memref<1x128xf32, #tpu.memory_space<vmem>>, vector<1x128xf32>
    %4 = vector.broadcast %3 : vector<1x128xf32> to vector<32x128xf32>
    %5 = arith.addf %2, %4 : vector<32x128xf32>
    %cst_5 = arith.constant 0.000000e+00 : f32
    %6 = vector.broadcast %cst_5 : f32 to vector<32x128xf32>
    %7 = arith.maximumf %5, %6 : vector<32x128xf32>
    %c0_6 = arith.constant 0 : index
    %c0_7 = arith.constant 0 : index
    %8 = vector.load %arg4[%c0_6, %c0_7] : memref<128x128xf32, #tpu.memory_space<vmem>>, vector<128x128xf32>
    %cst_8 = arith.constant dense<0.000000e+00> : vector<32x128xf32>
    %9 = tpu.matmul %7, %8, %cst_8 {dimension_numbers = #tpu.dot_dimension_numbers<[1], [0], [0], [1], [0, 0, 1, 1], [], []>} : vector<32x128xf32>, vector<128x128xf32>, vector<32x128xf32> -> vector<32x128xf32>
    %c0_9 = arith.constant 0 : index
    %c0_10 = arith.constant 0 : index
    %10 = vector.load %arg5[%c0_9, %c0_10] : memref<1x128xf32, #tpu.memory_space<vmem>>, vector<1x128xf32>
    %11 = vector.broadcast %10 : vector<1x128xf32> to vector<32x128xf32>
    %12 = arith.addf %9, %11 : vector<32x128xf32>
    %cst_11 = arith.constant 0.000000e+00 : f32
    %13 = vector.broadcast %cst_11 : f32 to vector<32x128xf32>
    %14 = arith.maximumf %12, %13 : vector<32x128xf32>
    %c0_12 = arith.constant 0 : index
    %c0_13 = arith.constant 0 : index
    %15 = vector.load %arg6[%c0_12, %c0_13] : memref<128x128xf32, #tpu.memory_space<vmem>>, vector<128x128xf32>
    %cst_14 = arith.constant dense<0.000000e+00> : vector<32x128xf32>
    %16 = tpu.matmul %14, %15, %cst_14 {dimension_numbers = #tpu.dot_dimension_numbers<[1], [0], [0], [1], [0, 0, 1, 1], [], []>} : vector<32x128xf32>, vector<128x128xf32>, vector<32x128xf32> -> vector<32x128xf32>
    %c0_15 = arith.constant 0 : index
    %c0_16 = arith.constant 0 : index
    %17 = vector.load %arg7[%c0_15, %c0_16] : memref<1x128xf32, #tpu.memory_space<vmem>>, vector<1x128xf32>
    %18 = vector.broadcast %17 : vector<1x128xf32> to vector<32x128xf32>
    %19 = arith.addf %16, %18 : vector<32x128xf32>
    %c0_17 = arith.constant 0 : index
    %c0_18 = arith.constant 0 : index
    %20 = vector.load %arg8[%c0_17, %c0_18] : memref<32x128xf32, #tpu.memory_space<vmem>>, vector<32x128xf32>
    tpu.vector_store %arg8[%c0_17, %c0_18], %19 {strides = array<i32>} : memref<32x128xf32, #tpu.memory_space<vmem>>, vector<32x128xf32>,
    return
  }
  func.func @transform_0(%arg0: i32) -> (i32, i32) {
    %c0_i32 = arith.constant 0 : i32
    %c0_i32_0 = arith.constant 0 : i32
    return %arg0, %c0_i32 : i32, i32
  }
  func.func @transform_1(%arg0: i32) -> (i32, i32) {
    %c0_i32 = arith.constant 0 : i32
    %c0_i32_0 = arith.constant 0 : i32
    %c0_i32_1 = arith.constant 0 : i32
    return %c0_i32, %c0_i32_0 : i32, i32
  }
  func.func @transform_2(%arg0: i32) -> (i32, i32) {
    %c0_i32 = arith.constant 0 : i32
    %c0_i32_0 = arith.constant 0 : i32
    %c0_i32_1 = arith.constant 0 : i32
    return %c0_i32, %c0_i32_0 : i32, i32
  }
  func.func @transform_3(%arg0: i32) -> (i32, i32) {
    %c0_i32 = arith.constant 0 : i32
    %c0_i32_0 = arith.constant 0 : i32
    %c0_i32_1 = arith.constant 0 : i32
    return %c0_i32, %c0_i32_0 : i32, i32
  }
  func.func @transform_4(%arg0: i32) -> (i32, i32) {
    %c0_i32 = arith.constant 0 : i32
    %c0_i32_0 = arith.constant 0 : i32
    %c0_i32_1 = arith.constant 0 : i32
    return %c0_i32, %c0_i32_0 : i32, i32
  }
  func.func @transform_5(%arg0: i32) -> (i32, i32) {
    %c0_i32 = arith.constant 0 : i32
    %c0_i32_0 = arith.constant 0 : i32
    %c0_i32_1 = arith.constant 0 : i32
    return %c0_i32, %c0_i32_0 : i32, i32
  }
  func.func @transform_6(%arg0: i32) -> (i32, i32) {
    %c0_i32 = arith.constant 0 : i32
    %c0_i32_0 = arith.constant 0 : i32
    %c0_i32_1 = arith.constant 0 : i32
    return %c0_i32, %c0_i32_0 : i32, i32
  }
  func.func @transform_7(%arg0: i32) -> (i32, i32) {
    %c0_i32 = arith.constant 0 : i32
    %c0_i32_0 = arith.constant 0 : i32
    return %arg0, %c0_i32 : i32, i32
  }
}

</mosaic_0001>

<bundles_post_ra>
// kernel: dqn_forward.1
= control target key start
LH: loop header
LB: loop body
LE: loop exit
PB: predicated region body
PF: predicated region fallthrough
CT: control target
= control target key end

     0   :  { %12 = vsyncpa [#allocation3], 0  ;;  %s679_s0 = inlined_call_operand.vmem [shape: f32[32,16], index: 0, kind: input, shape index: {}]   ;;  %s680_s1 = inlined_call_operand.vmem [shape: f32[16,128], index: 1, kind: input, shape index: {}]   ;;  %s681_s2 = inlined_call_operand.vmem [shape: f32[1,128], index: 2, kind: input, shape index: {}]   ;;  %s682_s3 = inlined_call_operand.hbm [shape: f32[128,128], index: 3, kind: input, shape index: {}]   ;;  %s683_s4 = inlined_call_operand.vmem [shape: f32[1,128], index: 4, kind: input, shape index: {}]   ;;  %s684_s5 = inlined_call_operand.hbm [shape: f32[128,128], index: 5, kind: input, shape index: {}]   ;;  %s685_s6 = inlined_call_operand.vmem [shape: f32[1,128], index: 6, kind: input, shape index: {}]   ;;  %s686_s7 = inlined_call_operand.vmem [shape: f32[32,128], index: 7, kind: output, shape index: {}]  }
   0x1   :  { %13 = vsyncpa [#allocation5], 0  ;;  %s586_s24 = smov [#allocation2]  }
   0x2   :  { %s25_s25 = sshll.u32 %s586_s24, 4  ;;  %s26_s25 = int_to_ptr.vmem [resolvable:$true] %s25_s25 }
   0x3   :  { %s550_s26 = scalar_lea.vmem %s26_s25, 2048  ;;  %p555_p1 = scmp.lt.s32.totalorder %s26_s25, %s26_s25 }
   0x4   :  { %p551_p0 = scmp.ne.s32.totalorder %s26_s25, %s550_s26  ;;  %p556_p2 = scmp.lt.s32.totalorder %s550_s26, %s550_s26 }
   0x6   :  { %p557_p3 = por %p556_p2, %p555_p1 }
   0x8   :  { %p558_p4 = pnand %p557_p3, %p551_p0 }
   0xa   :  { %561 = shalt.err (!%p558_p4)
}
   0xb   :  { %s587_s27 = smov 128   ;;  %s588_s28 = smov 8  }
   0xc   :  { %31 = dma.hbm_to_vmem [thread:$0]  %s682_s3, 2048, %s26_s25, [#allocation3], %s587_s27, %s587_s27, %s588_s28  }
   0xd   :  { %s589_s8 = smov [#allocation4]  }
   0xe   :  { %s39_s9 = sshll.u32 %s589_s8, 4  ;;  %s40_s9 = int_to_ptr.vmem [resolvable:$true] %s39_s9 }
   0xf   :  { %s570_s10 = scalar_lea.vmem %s40_s9, 2048  ;;  %p575_p6 = scmp.lt.s32.totalorder %s40_s9, %s40_s9 }
  0x10   :  { %p571_p5 = scmp.ne.s32.totalorder %s40_s9, %s570_s10  ;;  %p576_p7 = scmp.lt.s32.totalorder %s570_s10, %s570_s10 }
  0x12   :  { %p577_p8 = por %p576_p7, %p575_p6 }
  0x14   :  { %p578_p9 = pnand %p577_p8, %p571_p5 }
  0x16   :  { %581 = shalt.err (!%p578_p9)
}
  0x17   :  { %45 = dma.hbm_to_vmem [thread:$0]  %s684_s5, 2048, %s40_s9, [#allocation5], %s587_s27, %s587_s27, %s588_s28  }
  0x18   :  { %582 = dma.done.wait [#allocation3], 2048  }
  0x19   :  { %583 = vsyncadd [#allocation3], 4294965248 }
  0x1a   :  { %584 = dma.done.wait [#allocation5], 2048  }
  0x1b   :  { %585 = vsyncadd [#allocation5], 4294965248  ;;  %vm67_vm0 = vcmask 130048   ;;  %v59_v0 = vld [vmem:[%s680_s1 + $0x8] sm:$0xff]  ;;  %v58_v1 = vld [vmem:[%s680_s1] sm:$0xff] }
  0x1c   :  { %v54_v2 = vld [vmem:[%s679_s0] sm:$0xff]  ;;  %452 = vmatprep.subr.mxu0 %v59_v0  ;;  %v55_v3 = vld [vmem:[%s679_s0 + $0x8] sm:$0xff]  ;;  %v184_v4 = vld [vmem:[#allocation2 + $0x78] sm:$0xff] }
  0x1d   :  { %456 = vmatprep.mubr.msk.f32.mxu0 %vm67_vm0, %v54_v2  ;;  %453 = vmatpush3.msra.mxu0 %v59_v0  ;;  %v183_v5 = vld [vmem:[#allocation2 + $0x70] sm:$0xff]  ;;  %v182_v7 = vld [vmem:[#allocation2 + $0x68] sm:$0xff]  ;;  %v57_v8 = vld [vmem:[%s679_s0 + $0x18] sm:$0xff] }
  0x1e   :  { %454 = vmatprep.subr.mxu0 %v58_v1  ;;  %v56_v6 = vld [vmem:[%s679_s0 + $0x10] sm:$0xff]  ;;  %462 = vmatprep.subr.mxu1 %v184_v4  ;;  %v181_v9 = vld [vmem:[#allocation2 + $0x60] sm:$0xff]  ;;  %v180_v10 = vld [vmem:[#allocation2 + $0x58] sm:$0xff] }
  0x1f   :  { %455 = vmatpush3.msra.mxu0 %v58_v1  ;;  %463 = vmatpush3.msra.mxu1 %v184_v4  ;;  %v179_v11 = vld [vmem:[#allocation2 + $0x50] sm:$0xff]  ;;  %v178_v12 = vld [vmem:[#allocation2 + $0x48] sm:$0xff]  ;;  %v177_v13 = vld [vmem:[#allocation2 + $0x40] sm:$0xff] }
  0x20   :  { %457 = vmatmul.mubr.msk.f32.vlgmr.msra.gmra.mxu0 %vm67_vm0, %v55_v3  ;;  %464 = vmatprep.subr.mxu1 %v183_v5  ;;  %v176_v14 = vld [vmem:[#allocation2 + $0x38] sm:$0xff]  ;;  %v175_v15 = vld [vmem:[#allocation2 + $0x30] sm:$0xff]  ;;  %v174_v16 = vld [vmem:[#allocation2 + $0x28] sm:$0xff] }
  0x21   :  { %459 = vmatprep.mubr.msk.f32.mxu0 %vm67_vm0, %v56_v6  ;;  %465 = vmatpush3.msra.mxu1 %v183_v5  ;;  %v173_v17 = vld [vmem:[#allocation2 + $0x20] sm:$0xff]  ;;  %v172_v18 = vld [vmem:[#allocation2 + $0x18] sm:$0xff]  ;;  %v171_v19 = vld [vmem:[#allocation2 + $0x10] sm:$0xff] }
  0x22   :  { %466 = vmatprep.subr.mxu1 %v182_v7  ;;  %v170_v20 = vld [vmem:[#allocation2 + $0x8] sm:$0xff]  ;;  %v169_v21 = vld [vmem:[#allocation2] sm:$0xff]  ;;  %v296_v22 = vld [vmem:[#allocation4 + $0x78] sm:$0xff] }
  0x23   :  { %467 = vmatpush3.msra.mxu1 %v182_v7  ;;  %v295_v23 = vld [vmem:[#allocation4 + $0x70] sm:$0xff]  ;;  %500 = vmatprep.subr.mxu0 %v296_v22  ;;  %v294_v24 = vld [vmem:[#allocation4 + $0x68] sm:$0xff]  ;;  %v293_v25 = vld [vmem:[#allocation4 + $0x60] sm:$0xff] }
  0x24   :  { %460 = vmatmul.mubr.msk.f32.gmra.mxu0 %vm67_vm0, %v57_v8  ;;  %468 = vmatprep.subr.mxu1 %v181_v9  ;;  %v292_v26 = vld [vmem:[#allocation4 + $0x58] sm:$0xff]  ;;  %v291_v27 = vld [vmem:[#allocation4 + $0x50] sm:$0xff]  ;;  %v290_v28 = vld [vmem:[#allocation4 + $0x48] sm:$0xff] }
  0x25   :  { %469 = vmatpush3.msra.mxu1 %v181_v9  ;;  %501 = vmatpush3.msra.mxu0 %v296_v22  ;;  %v289_v29 = vld [vmem:[#allocation4 + $0x40] sm:$0xff]  ;;  %v288_v30 = vld [vmem:[#allocation4 + $0x38] sm:$0xff]  ;;  %v287_v31 = vld [vmem:[#allocation4 + $0x30] sm:$0xff] }
  0x26   :  { %470 = vmatprep.subr.mxu1 %v180_v10  ;;  %502 = vmatprep.subr.mxu0 %v295_v23  ;;  %v286_v32 = vld [vmem:[#allocation4 + $0x28] sm:$0xff]  ;;  %v285_v33 = vld [vmem:[#allocation4 + $0x20] sm:$0xff]  ;;  %v284_v47 = vld [vmem:[#allocation4 + $0x18] sm:$0xff] }
  0x27   :  { %471 = vmatpush3.msra.mxu1 %v180_v10  ;;  %503 = vmatpush3.msra.mxu0 %v295_v23  ;;  %v399_v34 = vld [vmem:[%s681_s2] ss:$0 sm:$0xff]  ;;  %v283_v48 = vld [vmem:[#allocation4 + $0x10] sm:$0xff]  ;;  %v282_v49 = vld [vmem:[#allocation4 + $0x8] sm:$0xff] }
  0x28   :  { %472 = vmatprep.subr.mxu1 %v179_v11  ;;  %504 = vmatprep.subr.mxu0 %v294_v24  ;;  %v281_v50 = vld [vmem:[#allocation4] sm:$0xff] }
  0x29   :  { %473 = vmatpush3.msra.mxu1 %v179_v11  ;;  %505 = vmatpush3.msra.mxu0 %v294_v24  ;;  %v404_v51 = vld [vmem:[%s683_s4] ss:$0 sm:$0xff] }
  0x2a   :  { %474 = vmatprep.subr.mxu1 %v178_v12  ;;  %506 = vmatprep.subr.mxu0 %v293_v25  ;;  %v405_v0 = vld [vmem:[%s685_s6] ss:$0 sm:$0xff] }
  0x2b   :  { %475 = vmatpush3.msra.mxu1 %v178_v12  ;;  %507 = vmatpush3.msra.mxu0 %v293_v25 }
  0x2c   :  { %476 = vmatprep.subr.mxu1 %v177_v13  ;;  %508 = vmatprep.subr.mxu0 %v292_v26 }
  0x2d   :  { %477 = vmatpush3.msra.mxu1 %v177_v13  ;;  %509 = vmatpush3.msra.mxu0 %v292_v26 }
  0x2e   :  { %478 = vmatprep.subr.mxu1 %v176_v14  ;;  %510 = vmatprep.subr.mxu0 %v291_v27 }
  0x2f   :  { %479 = vmatpush3.msra.mxu1 %v176_v14  ;;  %511 = vmatpush3.msra.mxu0 %v291_v27 }
  0x30   :  { %480 = vmatprep.subr.mxu1 %v175_v15  ;;  %512 = vmatprep.subr.mxu0 %v290_v28 }
  0x31   :  { %481 = vmatpush3.msra.mxu1 %v175_v15  ;;  %513 = vmatpush3.msra.mxu0 %v290_v28 }
  0x32   :  { %482 = vmatprep.subr.mxu1 %v174_v16  ;;  %514 = vmatprep.subr.mxu0 %v289_v29 }
  0x33   :  { %483 = vmatpush3.msra.mxu1 %v174_v16  ;;  %515 = vmatpush3.msra.mxu0 %v289_v29 }
  0x34   :  { %484 = vmatprep.subr.mxu1 %v173_v17  ;;  %516 = vmatprep.subr.mxu0 %v288_v30 }
  0x35   :  { %485 = vmatpush3.msra.mxu1 %v173_v17  ;;  %517 = vmatpush3.msra.mxu0 %v288_v30 }
  0x36   :  { %486 = vmatprep.subr.mxu1 %v172_v18  ;;  %518 = vmatprep.subr.mxu0 %v287_v31 }
  0x37   :  { %487 = vmatpush3.msra.mxu1 %v172_v18  ;;  %519 = vmatpush3.msra.mxu0 %v287_v31 }
  0x38   :  { %488 = vmatprep.subr.mxu1 %v171_v19  ;;  %520 = vmatprep.subr.mxu0 %v286_v32 }
  0x39   :  { %489 = vmatpush3.msra.mxu1 %v171_v19  ;;  %521 = vmatpush3.msra.mxu0 %v286_v32 }
  0x3a   :  { %490 = vmatprep.subr.mxu1 %v170_v20  ;;  %522 = vmatprep.subr.mxu0 %v285_v33 }
  0x3b   :  { %491 = vmatpush3.msra.mxu1 %v170_v20  ;;  %523 = vmatpush3.msra.mxu0 %v285_v33 }
  0x3c   :  { %492 = vmatprep.subr.mxu1 %v169_v21  ;;  %524 = vmatprep.subr.mxu0 %v284_v47 }
  0x3d   :  { %493 = vmatpush3.msra.mxu1 %v169_v21  ;;  %525 = vmatpush3.msra.mxu0 %v284_v47 }
  0x3e   :  { %526 = vmatprep.subr.mxu0 %v283_v48 }
  0x3f   :  { %527 = vmatpush3.msra.mxu0 %v283_v48 }
  0x40   :  { %528 = vmatprep.subr.mxu0 %v282_v49 }
  0x41   :  { %529 = vmatpush3.msra.mxu0 %v282_v49 }
  0x42   :  { %530 = vmatprep.subr.mxu0 %v281_v50 }
  0x43   :  { %531 = vmatpush3.msra.mxu0 %v281_v50 }
  0xe0   :  { %v458_v35 = vpop.f32.mrf.mxu0 }
  0xe1   :  { %v152_v36 = vadd.f32 %v458_v35, %v399_v34 }
  0xe2   :  { %v146_v37 = vpop.f32.mrf.mxu0 }
  0xe3   :  { %v147_v38 = vadd.f32 %v399_v34, %v146_v37  ;;  %v166_v41 = vmax.f32 %v152_v36, 0.0 }
  0xe4   :  { %v461_v39 = vpop.f32.mrf.mxu0 }
  0xe5   :  { %v165_v40 = vmax.f32 %v147_v38, 0.0  ;;  %v162_v42 = vadd.f32 %v461_v39, %v399_v34 }
  0xe6   :  { %v156_v43 = vpop.f32.mrf.mxu0 }
  0xe7   :  { %v157_v44 = vadd.f32 %v399_v34, %v156_v43  ;;  %494 = vmatprep.mubr.f32.mxu1 %v165_v40  ;;  %v168_v46 = vmax.f32 %v162_v42, 0.0 }
  0xe8   :  { %495 = vmatmul.mubr.f32.vlgmr.msra.gmra.mxu1 %v166_v41 }
  0xe9   :  { %v167_v45 = vmax.f32 %v157_v44, 0.0 }
  0xeb   :  { %497 = vmatprep.mubr.f32.mxu1 %v167_v45 }
  0xec   :  { %498 = vmatmul.mubr.f32.gmra.mxu1 %v168_v46 }
 0x1a8   :  { %v496_v52 = vpop.f32.mrf.mxu1 }
 0x1a9   :  { %v264_v53 = vadd.f32 %v496_v52, %v404_v51 }
 0x1aa   :  { %v258_v54 = vpop.f32.mrf.mxu1 }
 0x1ab   :  { %v259_v55 = vadd.f32 %v404_v51, %v258_v54  ;;  %v278_v58 = vmax.f32 %v264_v53, 0.0 }
 0x1ac   :  { %v499_v56 = vpop.f32.mrf.mxu1 }
 0x1ad   :  { %v277_v57 = vmax.f32 %v259_v55, 0.0  ;;  %v274_v59 = vadd.f32 %v499_v56, %v404_v51 }
 0x1ae   :  { %v268_v60 = vpop.f32.mrf.mxu1 }
 0x1af   :  { %v269_v61 = vadd.f32 %v404_v51, %v268_v60  ;;  %532 = vmatprep.mubr.f32.mxu0 %v277_v57  ;;  %v280_v63 = vmax.f32 %v274_v59, 0.0 }
 0x1b0   :  { %533 = vmatmul.mubr.f32.vlgmr.msra.gmra.mxu0 %v278_v58 }
 0x1b1   :  { %v279_v62 = vmax.f32 %v269_v61, 0.0 }
 0x1b3   :  { %535 = vmatprep.mubr.f32.mxu0 %v279_v62 }
 0x1b4   :  { %536 = vmatmul.mubr.f32.gmra.mxu0 %v280_v63 }
 0x270   :  { %v534_v1 = vpop.f32.mrf.mxu0 }
 0x271   :  { %v376_v2 = vadd.f32 %v534_v1, %v405_v0 }
 0x272   :  { %v370_v3 = vpop.f32.mrf.mxu0 }
 0x273   :  { %390 = vst [vmem:[%s686_s7 + $0x8] sm:$0xff] %v376_v2  ;;  %v371_v4 = vadd.f32 %v405_v0, %v370_v3 }
 0x274   :  { %v537_v5 = vpop.f32.mrf.mxu0 }
 0x275   :  { %389 = vst [vmem:[%s686_s7] sm:$0xff] %v371_v4  ;;  %v386_v6 = vadd.f32 %v537_v5, %v405_v0 }
 0x276   :  { %v380_v7 = vpop.f32.mrf.mxu0 }
 0x277   :  { %392 = vst [vmem:[%s686_s7 + $0x18] sm:$0xff] %v386_v6  ;;  %v381_v8 = vadd.f32 %v405_v0, %v380_v7 }
 0x279   :  { %391 = vst [vmem:[%s686_s7 + $0x10] sm:$0xff] %v381_v8 }
 0x27a   :  { %397 = vsyncpa [#allocation3], 1 }
 0x27b   :  { %398 = vsyncpa [#allocation5], 1 }

</bundles_post_ra>
